<compile_context>
chip_gen: v6e
topology: v6e:2x2x1
jax: 0.10.0
libtpu: 0.0.40
codegen_flags: <defaults>
</compile_context>

<pallas_src>
import functools

import jax
import jax.numpy as jnp
from jax import lax
from jax.experimental import pallas as pl
from jax.experimental.pallas import tpu as pltpu


# ----------------------------------------------------------------------------
# Shared attention tail: per-head causal softmax attention written into a
# concat scratch, followed by ONE fused output-projection matmul.
# ----------------------------------------------------------------------------
def _attention_tail(wp, bias, o_ref, q_scr, k_scr, v_scr, cat_scr, *,
                    num_heads, approx_recip):
    Bb, T, C = q_scr.shape
    H = num_heads
    Hs = C // H
    mxu_dtype = q_scr.dtype

    # Causal (lower-triangular) mask; broadcast across the batch block & heads.
    row = lax.broadcasted_iota(jnp.int32, (T, T), 0)
    col = lax.broadcasted_iota(jnp.int32, (T, T), 1)
    causal = (col <= row)[None]                                  # (1, T, T)

    # Static unroll over heads.  All cross-head state lives in VMEM scratch
    # (no functional carry), so each iteration's temporaries die at its store.
    for h in range(H):
        lo, hi = h * Hs, (h + 1) * Hs
        qh = q_scr[:, :, lo:hi]                                  # (Bb, T, Hs), pre-scaled
        kh = k_scr[:, :, lo:hi]
        vh = v_scr[:, :, lo:hi]

        s = jnp.einsum("bqd,bkd->bqk", qh, kh,
                       preferred_element_type=jnp.float32)       # (Bb, T, T)
        s = jnp.where(causal, s, -jnp.inf)                       # diag never masked

        # Numerically-stable softmax; statistics stay in f32.
        s = s - jnp.max(s, axis=-1, keepdims=True)
        p = jnp.exp(s)
        denom = jnp.sum(p, axis=-1, keepdims=True)
        if approx_recip:
            p = p * pl.reciprocal(denom, approx=True)            # EUP slot (fast path)
        else:
            p = p / denom                                        # exact (strict path)

        head = jnp.einsum("bqk,bkd->bqd", p.astype(mxu_dtype), vh,
                          preferred_element_type=jnp.float32)    # (Bb, T, Hs)
        cat_scr[:, :, lo:hi] = head.astype(cat_scr.dtype)

    # Single output projection over the concatenated heads: M = Bb*T, K = C.
    cat = cat_scr[...].reshape(Bb * T, C)
    out = jnp.dot(cat, wp, preferred_element_type=jnp.float32) + bias
    o_ref[...] = out.reshape(Bb, T, C).astype(o_ref.dtype)


# ----------------------------------------------------------------------------
# Self-attention kernel: one activation input, fused (C, 3C) QKV weight.
# ----------------------------------------------------------------------------
def _mha_self_kernel(x_ref, wqkv_ref, wp_ref, b_ref, o_ref,
                     q_scr, k_scr, v_scr, cat_scr, *, num_heads, approx_recip):
    Bb, T, C = x_ref.shape
    w_qkv = wqkv_ref[...]                                        # (C, 3C), pre-cast
    x = x_ref[...].reshape(Bb * T, C).astype(w_qkv.dtype)

    # One full-width QKV projection: (Bb*T, C) x (C, 3C).
    qkv = jnp.dot(x, w_qkv, preferred_element_type=jnp.float32)
    q_scr[...] = qkv[:, :C].reshape(Bb, T, C).astype(q_scr.dtype)
    k_scr[...] = qkv[:, C:2 * C].reshape(Bb, T, C).astype(k_scr.dtype)
    v_scr[...] = qkv[:, 2 * C:].reshape(Bb, T, C).astype(v_scr.dtype)

    _attention_tail(wp_ref[...], b_ref[...], o_ref, q_scr, k_scr, v_scr,
                    cat_scr, num_heads=num_heads, approx_recip=approx_recip)


# ----------------------------------------------------------------------------
# Cross-attention kernel: separate q/k/v activations, same fused QKV weight.
# ----------------------------------------------------------------------------
def _mha_cross_kernel(q_ref, k_ref, v_ref, wqkv_ref, wp_ref, b_ref, o_ref,
                      q_scr, k_scr, v_scr, cat_scr, *, num_heads, approx_recip):
    Bb, T, C = q_ref.shape
    w_qkv = wqkv_ref[...]                                        # (C, 3C)
    mxu_dtype = w_qkv.dtype

    def proj(act_ref, w_cols, scr):
        act = act_ref[...].reshape(Bb * T, C).astype(mxu_dtype)
        y = jnp.dot(act, w_cols, preferred_element_type=jnp.float32)
        scr[...] = y.reshape(Bb, T, C).astype(scr.dtype)

    proj(q_ref, w_qkv[:, :C], q_scr)
    proj(k_ref, w_qkv[:, C:2 * C], k_scr)
    proj(v_ref, w_qkv[:, 2 * C:], v_scr)

    _attention_tail(wp_ref[...], b_ref[...], o_ref, q_scr, k_scr, v_scr,
                    cat_scr, num_heads=num_heads, approx_recip=approx_recip)


# ----------------------------------------------------------------------------
# Wrapper
# ----------------------------------------------------------------------------
def _choose_batch_block(B, T, target_rows=512):
    """Largest divisor of B with batch_block*T <= target_rows, keeping >= 2
    grid steps when possible (v7x has two TensorCores per chip)."""
    bb = 1
    for d in range(1, B + 1):
        if B % d == 0 and d * T <= target_rows:
            bb = d
    if bb == B and B > 1:
        for d in range(B // 2, 0, -1):
            if B % d == 0:
                bb = d
                break
    return bb


@functools.partial(jax.jit, static_argnames=("num_heads", "use_bf16_mxu",
                                              "batch_block", "self_attn"))
def _mha_impl(query, key, value, wq, wk, wv, w_proj_t, b_proj, *,
              num_heads, use_bf16_mxu, batch_block, self_attn):
    B, T, C = query.shape
    H = num_heads
    Hs = C // H
    Bb = batch_block
    mxu_dtype = jnp.bfloat16 if use_bf16_mxu else jnp.float32

    # Per-head (H, C, Hs) weights -> full-width (C, C): head h occupies columns
    # [h*Hs, (h+1)*Hs), matching torch.cat([...], dim=-1).  The 1/sqrt(Hs)
    # attention scale is folded into the Q weight columns, and weights are cast
    # to the MXU dtype ONCE here instead of per grid step.
    scale = float(Hs) ** -0.5
    wq_full = jnp.transpose(wq, (1, 0, 2)).reshape(C, C) * scale
    wk_full = jnp.transpose(wk, (1, 0, 2)).reshape(C, C)
    wv_full = jnp.transpose(wv, (1, 0, 2)).reshape(C, C)
    w_qkv = jnp.concatenate([wq_full, wk_full, wv_full], axis=1).astype(mxu_dtype)
    wp = w_proj_t.astype(mxu_dtype)                              # (C, C) = W_proj^T

    act_spec = pl.BlockSpec((Bb, T, C), lambda b: (b, 0, 0))
    w_qkv_spec = pl.BlockSpec((C, 3 * C), lambda b: (0, 0))
    wp_spec = pl.BlockSpec((C, C), lambda b: (0, 0))
    bias_spec = pl.BlockSpec((1, C), lambda b: (0, 0))

    # q / k / v / concat scratch (mxu dtype) — ref-mediated head-loop state.
    scratch = [pltpu.VMEM((Bb, T, C), mxu_dtype)] * 4

    common = dict(num_heads=H, approx_recip=use_bf16_mxu)
    if self_attn:
        kernel = functools.partial(_mha_self_kernel, **common)
        in_specs = [act_spec, w_qkv_spec, wp_spec, bias_spec]
        operands = (query, w_qkv, wp, b_proj)
    else:
        kernel = functools.partial(_mha_cross_kernel, **common)
        in_specs = [act_spec, act_spec, act_spec, w_qkv_spec, wp_spec, bias_spec]
        operands = (query, key, value, w_qkv, wp, b_proj)

    return pl.pallas_call(
        kernel,
        out_shape=jax.ShapeDtypeStruct((B, T, C), query.dtype),
        grid_spec=pltpu.PrefetchScalarGridSpec(
            num_scalar_prefetch=0,
            grid=(B // Bb,),
            in_specs=in_specs,
            out_specs=pl.BlockSpec((Bb, T, C), lambda b: (b, 0, 0)),
            scratch_shapes=scratch,
        ),
        compiler_params=pltpu.CompilerParams(
            dimension_semantics=("parallel",),
        ),
    )(*operands)


def multi_head_attention(query, key, value, wq, wk, wv, w_proj_t, b_proj, *,
                         num_heads, use_bf16_mxu=True, batch_block=None):
    """Causal multi-head attention + output projection (dropout = identity)."""
    B, T, C = query.shape
    assert C % num_heads == 0
    # Self-attention fast path (single activation DMA + fused (C,3C) matmul).
    self_attn = (query is key) and (key is value)
    if batch_block is None:
        batch_block = _choose_batch_block(B, T)
    assert B % batch_block == 0
    return _mha_impl(query, key, value, wq, wk, wv, w_proj_t, b_proj,
                     num_heads=num_heads, use_bf16_mxu=use_bf16_mxu,
                     batch_block=batch_block, self_attn=self_attn)


# ----------------------------------------------------------------------------
# Pure-JAX reference (mirrors the PyTorch forward exactly, dropout = identity).
# ----------------------------------------------------------------------------
def _reference(query, key, value, wq, wk, wv, w_proj_t, b_proj, num_heads):
    B, T, C = key.shape
    H = num_heads
    Hs = C // H
    heads = []
    for h in range(H):
        qh = query @ wq[h]
        kh = key @ wk[h]
        vh = value @ wv[h]
        wei = (qh @ jnp.swapaxes(kh, -2, -1)) * (Hs ** -0.5)
        mask = jnp.tril(jnp.ones((T, T), dtype=bool))
        wei = jnp.where(mask, wei, -jnp.inf)
        wei = jax.nn.softmax(wei, axis=-1)
        heads.append(wei @ vh)
    concat = jnp.concatenate(heads, axis=-1)
    return concat @ w_proj_t + b_proj[0]


if __name__ == "__main__":
    B, T, C, H = 2, 8, 32, 4
    Hs = C // H

    key_rng = jax.random.PRNGKey(0)
    ks = jax.random.split(key_rng, 8)

    query = jax.random.normal(ks[0], (B, T, C), dtype=jnp.float32)
    key_ = jax.random.normal(ks[1], (B, T, C), dtype=jnp.float32)
    value = jax.random.normal(ks[2], (B, T, C), dtype=jnp.float32)

    # Deterministic synthetic parameters (nn.Linear weights, stored
    # pre-transposed for right-multiplication).
    scale = 1.0 / jnp.sqrt(jnp.float32(C))
    wq = jax.random.normal(ks[3], (H, C, Hs), dtype=jnp.float32) * scale
    wk = jax.random.normal(ks[4], (H, C, Hs), dtype=jnp.float32) * scale
    wv = jax.random.normal(ks[5], (H, C, Hs), dtype=jnp.float32) * scale
    w_proj_t = jax.random.normal(ks[6], (C, C), dtype=jnp.float32) * scale
    b_proj = jax.random.normal(ks[7], (1, C), dtype=jnp.float32) * 0.1

    # ---------------- cross-attention path (distinct q / k / v) -------------
    ref_cross = _reference(query, key_, value, wq, wk, wv, w_proj_t, b_proj, H)

    out_f32 = multi_head_attention(query, key_, value, wq, wk, wv, w_proj_t,
                                   b_proj, num_heads=H, use_bf16_mxu=False)
    out_f32 = jax.block_until_ready(out_f32)
    assert out_f32.shape == (B, T, C)
    assert jnp.allclose(out_f32, ref_cross, atol=5e-3, rtol=5e-3), "cross f32 mismatch"

    out_bf16 = multi_head_attention(query, key_, value, wq, wk, wv, w_proj_t,
                                    b_proj, num_heads=H, use_bf16_mxu=True)
    out_bf16 = jax.block_until_ready(out_bf16)
    assert out_bf16.shape == (B, T, C)
    assert jnp.allclose(out_bf16, ref_cross, atol=5e-2, rtol=5e-2), "cross bf16 mismatch"

    # ---------------- self-attention path (fused (C, 3C) QKV matmul) --------
    x = query
    ref_self = _reference(x, x, x, wq, wk, wv, w_proj_t, b_proj, H)

    out_self_f32 = multi_head_attention(x, x, x, wq, wk, wv, w_proj_t, b_proj,
                                        num_heads=H, use_bf16_mxu=False)
    out_self_f32 = jax.block_until_ready(out_self_f32)
    assert jnp.allclose(out_self_f32, ref_self, atol=5e-3, rtol=5e-3), "self f32 mismatch"

    out_self_bf16 = multi_head_attention(x, x, x, wq, wk, wv, w_proj_t, b_proj,
                                         num_heads=H, use_bf16_mxu=True)
    out_self_bf16 = jax.block_until_ready(out_self_bf16)
    assert jnp.allclose(out_self_bf16, ref_self, atol=5e-2, rtol=5e-2), "self bf16 mismatch"

    print("KERNEL_OK")
</pallas_src>

<mosaic_0001>
module attributes {stable_mosaic.version = 11 : i64} {
  func.func @_mha_cross_kernel(%arg0: i32, %arg1: memref<1x8x32xf32, #tpu.memory_space<vmem>>, %arg2: memref<1x8x32xf32, #tpu.memory_space<vmem>>, %arg3: memref<1x8x32xf32, #tpu.memory_space<vmem>>, %arg4: memref<32x96xf32, #tpu.memory_space<vmem>>, %arg5: memref<32x32xf32, #tpu.memory_space<vmem>>, %arg6: memref<1x32xf32, #tpu.memory_space<vmem>>, %arg7: memref<1x8x32xf32, #tpu.memory_space<vmem>>, %arg8: memref<1x8x32xf32, #tpu.memory_space<vmem>>, %arg9: memref<1x8x32xf32, #tpu.memory_space<vmem>>, %arg10: memref<1x8x32xf32, #tpu.memory_space<vmem>>, %arg11: memref<1x8x32xf32, #tpu.memory_space<vmem>>) attributes {dimension_semantics = [#tpu.dimension_semantics<parallel>], iteration_bounds = array<i64: 2>, scalar_prefetch = 0 : i64, scratch_operands = 4 : i64, tpu.core_type = #tpu.core_type<tc>, window_params = [{transform_indices = @transform_0, window_bounds = array<i64: 1, 8, 32>}, {transform_indices = @transform_1, window_bounds = array<i64: 1, 8, 32>}, {transform_indices = @transform_2, window_bounds = array<i64: 1, 8, 32>}, {pipeline_mode = #tpu.pipeline_mode<synchronous>, transform_indices = @transform_3, window_bounds = array<i64: 32, 96>}, {pipeline_mode = #tpu.pipeline_mode<synchronous>, transform_indices = @transform_4, window_bounds = array<i64: 32, 32>}, {pipeline_mode = #tpu.pipeline_mode<synchronous>, transform_indices = @transform_5, window_bounds = array<i64: 1, 32>}, {transform_indices = @transform_6, window_bounds = array<i64: 1, 8, 32>}]} {
    %c0 = arith.constant 0 : index
    %c0_0 = arith.constant 0 : index
    %0 = vector.load %arg4[%c0, %c0_0] : memref<32x96xf32, #tpu.memory_space<vmem>>, vector<32x96xf32>
    %1 = vector.extract_strided_slice %0 {offsets = [0, 0], sizes = [32, 32], strides = [1, 1]} : vector<32x96xf32> to vector<32x32xf32>
    %c0_1 = arith.constant 0 : index
    %c0_2 = arith.constant 0 : index
    %c0_3 = arith.constant 0 : index
    %2 = vector.load %arg1[%c0_1, %c0_2, %c0_3] : memref<1x8x32xf32, #tpu.memory_space<vmem>>, vector<1x8x32xf32>
    %3 = vector.shape_cast %2 : vector<1x8x32xf32> to vector<8x32xf32>
    %cst = arith.constant dense<0.000000e+00> : vector<8x32xf32>
    %4 = tpu.matmul %3, %1, %cst {dimension_numbers = #tpu.dot_dimension_numbers<[1], [0], [0], [1], [0, 0, 1, 1], [], []>} : vector<8x32xf32>, vector<32x32xf32>, vector<8x32xf32> -> vector<8x32xf32>
    %5 = vector.shape_cast %4 : vector<8x32xf32> to vector<1x8x32xf32>
    %c0_4 = arith.constant 0 : index
    %c0_5 = arith.constant 0 : index
    %c0_6 = arith.constant 0 : index
    %6 = vector.load %arg8[%c0_4, %c0_5, %c0_6] : memref<1x8x32xf32, #tpu.memory_space<vmem>>, vector<1x8x32xf32>
    tpu.vector_store %arg8[%c0_4, %c0_5, %c0_6], %5 {strides = array<i32>} : memref<1x8x32xf32, #tpu.memory_space<vmem>>, vector<1x8x32xf32>,
    %7 = vector.extract_strided_slice %0 {offsets = [0, 32], sizes = [32, 32], strides = [1, 1]} : vector<32x96xf32> to vector<32x32xf32>
    %c0_7 = arith.constant 0 : index
    %c0_8 = arith.constant 0 : index
    %c0_9 = arith.constant 0 : index
    %8 = vector.load %arg2[%c0_7, %c0_8, %c0_9] : memref<1x8x32xf32, #tpu.memory_space<vmem>>, vector<1x8x32xf32>
    %9 = vector.shape_cast %8 : vector<1x8x32xf32> to vector<8x32xf32>
    %cst_10 = arith.constant dense<0.000000e+00> : vector<8x32xf32>
    %10 = tpu.matmul %9, %7, %cst_10 {dimension_numbers = #tpu.dot_dimension_numbers<[1], [0], [0], [1], [0, 0, 1, 1], [], []>} : vector<8x32xf32>, vector<32x32xf32>, vector<8x32xf32> -> vector<8x32xf32>
    %11 = vector.shape_cast %10 : vector<8x32xf32> to vector<1x8x32xf32>
    %c0_11 = arith.constant 0 : index
    %c0_12 = arith.constant 0 : index
    %c0_13 = arith.constant 0 : index
    %12 = vector.load %arg9[%c0_11, %c0_12, %c0_13] : memref<1x8x32xf32, #tpu.memory_space<vmem>>, vector<1x8x32xf32>
    tpu.vector_store %arg9[%c0_11, %c0_12, %c0_13], %11 {strides = array<i32>} : memref<1x8x32xf32, #tpu.memory_space<vmem>>, vector<1x8x32xf32>,
    %13 = vector.extract_strided_slice %0 {offsets = [0, 64], sizes = [32, 32], strides = [1, 1]} : vector<32x96xf32> to vector<32x32xf32>
    %c0_14 = arith.constant 0 : index
    %c0_15 = arith.constant 0 : index
    %c0_16 = arith.constant 0 : index
    %14 = vector.load %arg3[%c0_14, %c0_15, %c0_16] : memref<1x8x32xf32, #tpu.memory_space<vmem>>, vector<1x8x32xf32>
    %15 = vector.shape_cast %14 : vector<1x8x32xf32> to vector<8x32xf32>
    %cst_17 = arith.constant dense<0.000000e+00> : vector<8x32xf32>
    %16 = tpu.matmul %15, %13, %cst_17 {dimension_numbers = #tpu.dot_dimension_numbers<[1], [0], [0], [1], [0, 0, 1, 1], [], []>} : vector<8x32xf32>, vector<32x32xf32>, vector<8x32xf32> -> vector<8x32xf32>
    %17 = vector.shape_cast %16 : vector<8x32xf32> to vector<1x8x32xf32>
    %c0_18 = arith.constant 0 : index
    %c0_19 = arith.constant 0 : index
    %c0_20 = arith.constant 0 : index
    %18 = vector.load %arg10[%c0_18, %c0_19, %c0_20] : memref<1x8x32xf32, #tpu.memory_space<vmem>>, vector<1x8x32xf32>
    tpu.vector_store %arg10[%c0_18, %c0_19, %c0_20], %17 {strides = array<i32>} : memref<1x8x32xf32, #tpu.memory_space<vmem>>, vector<1x8x32xf32>,
    %c0_21 = arith.constant 0 : index
    %c0_22 = arith.constant 0 : index
    %19 = vector.load %arg5[%c0_21, %c0_22] : memref<32x32xf32, #tpu.memory_space<vmem>>, vector<32x32xf32>
    %c0_23 = arith.constant 0 : index
    %c0_24 = arith.constant 0 : index
    %20 = vector.load %arg6[%c0_23, %c0_24] : memref<1x32xf32, #tpu.memory_space<vmem>>, vector<1x32xf32>
    %21 = tpu.iota {dimensions = array<i32: 0>} : vector<8x8xi32>
    %22 = tpu.iota {dimensions = array<i32: 1>} : vector<8x8xi32>
    %23 = arith.cmpi sle, %22, %21 : vector<8x8xi32>
    %24 = vector.shape_cast %23 : vector<8x8xi1> to vector<1x8x8xi1>
    %c0_25 = arith.constant 0 : index
    %c0_26 = arith.constant 0 : index
    %c0_27 = arith.constant 0 : index
    %25 = vector.load %arg8[%c0_25, %c0_26, %c0_27] : memref<1x8x32xf32, #tpu.memory_space<vmem>>, vector<1x8x8xf32>
    %c0_28 = arith.constant 0 : index
    %c0_29 = arith.constant 0 : index
    %c0_30 = arith.constant 0 : index
    %26 = vector.load %arg9[%c0_28, %c0_29, %c0_30] : memref<1x8x32xf32, #tpu.memory_space<vmem>>, vector<1x8x8xf32>
    %c0_31 = arith.constant 0 : index
    %c0_32 = arith.constant 0 : index
    %c0_33 = arith.constant 0 : index
    %27 = vector.load %arg10[%c0_31, %c0_32, %c0_33] : memref<1x8x32xf32, #tpu.memory_space<vmem>>, vector<1x8x8xf32>
    "tpu.trace_start"() <{level = 10 : i32, message = "bqd,bkd->bqk"}> : () -> ()
    %cst_34 = arith.constant dense<0.000000e+00> : vector<1x8x8xf32>
    %28 = tpu.matmul %25, %26, %cst_34 {dimension_numbers = #tpu.dot_dimension_numbers<[2], [2], [1], [1], [0, 0, 0, 1, 1, 1], [0], [0]>} : vector<1x8x8xf32>, vector<1x8x8xf32>, vector<1x8x8xf32> -> vector<1x8x8xf32>
    %cst_35 = arith.constant 0xFF800000 : f32
    "tpu.trace_stop"() : () -> ()
    %29 = vector.broadcast %cst_35 : f32 to vector<1x8x8xf32>
    %30 = arith.select %24, %28, %29 : vector<1x8x8xi1>, vector<1x8x8xf32>
    %cst_36 = arith.constant dense<0xFF800000> : vector<1x8xf32>
    %31 = vector.multi_reduction <maximumf>, %30, %cst_36 [2] : vector<1x8x8xf32> to vector<1x8xf32>
    %32 = vector.shape_cast %31 : vector<1x8xf32> to vector<1x8x1xf32>
    %33 = vector.broadcast %32 : vector<1x8x1xf32> to vector<1x8x8xf32>
    %34 = arith.subf %30, %33 : vector<1x8x8xf32>
    %35 = math.exp %34 : vector<1x8x8xf32>
    %cst_37 = arith.constant dense<0.000000e+00> : vector<1x8xf32>
    %36 = vector.multi_reduction <add>, %35, %cst_37 [2] : vector<1x8x8xf32> to vector<1x8xf32>
    %37 = vector.shape_cast %36 : vector<1x8xf32> to vector<1x8x1xf32>
    %38 = vector.broadcast %37 : vector<1x8x1xf32> to vector<1x8x8xf32>
    %39 = arith.divf %35, %38 : vector<1x8x8xf32>
    "tpu.trace_start"() <{level = 10 : i32, message = "bqk,bkd->bqd"}> : () -> ()
    %cst_38 = arith.constant dense<0.000000e+00> : vector<1x8x8xf32>
    %40 = tpu.matmul %39, %27, %cst_38 {dimension_numbers = #tpu.dot_dimension_numbers<[2], [1], [1], [2], [0, 0, 0, 1, 1, 2], [0], [0]>} : vector<1x8x8xf32>, vector<1x8x8xf32>, vector<1x8x8xf32> -> vector<1x8x8xf32>
    "tpu.trace_stop"() : () -> ()
    %c0_39 = arith.constant 0 : index
    %c0_40 = arith.constant 0 : index
    %c0_41 = arith.constant 0 : index
    %41 = vector.load %arg11[%c0_39, %c0_40, %c0_41] : memref<1x8x32xf32, #tpu.memory_space<vmem>>, vector<1x8x8xf32>
    tpu.vector_store %arg11[%c0_39, %c0_40, %c0_41], %40 {strides = array<i32>} : memref<1x8x32xf32, #tpu.memory_space<vmem>>, vector<1x8x8xf32>,
    %c0_42 = arith.constant 0 : index
    %c0_43 = arith.constant 0 : index
    %c8 = arith.constant 8 : index
    %42 = vector.load %arg8[%c0_42, %c0_43, %c8] : memref<1x8x32xf32, #tpu.memory_space<vmem>>, vector<1x8x8xf32>
    %c0_44 = arith.constant 0 : index
    %c0_45 = arith.constant 0 : index
    %c8_46 = arith.constant 8 : index
    %43 = vector.load %arg9[%c0_44, %c0_45, %c8_46] : memref<1x8x32xf32, #tpu.memory_space<vmem>>, vector<1x8x8xf32>
    %c0_47 = arith.constant 0 : index
    %c0_48 = arith.constant 0 : index
    %c8_49 = arith.constant 8 : index
    %44 = vector.load %arg10[%c0_47, %c0_48, %c8_49] : memref<1x8x32xf32, #tpu.memory_space<vmem>>, vector<1x8x8xf32>
    "tpu.trace_start"() <{level = 10 : i32, message = "bqd,bkd->bqk"}> : () -> ()
    %cst_50 = arith.constant dense<0.000000e+00> : vector<1x8x8xf32>
    %45 = tpu.matmul %42, %43, %cst_50 {dimension_numbers = #tpu.dot_dimension_numbers<[2], [2], [1], [1], [0, 0, 0, 1, 1, 1], [0], [0]>} : vector<1x8x8xf32>, vector<1x8x8xf32>, vector<1x8x8xf32> -> vector<1x8x8xf32>
    %cst_51 = arith.constant 0xFF800000 : f32
    "tpu.trace_stop"() : () -> ()
    %46 = vector.broadcast %cst_51 : f32 to vector<1x8x8xf32>
    %47 = arith.select %24, %45, %46 : vector<1x8x8xi1>, vector<1x8x8xf32>
    %cst_52 = arith.constant dense<0xFF800000> : vector<1x8xf32>
    %48 = vector.multi_reduction <maximumf>, %47, %cst_52 [2] : vector<1x8x8xf32> to vector<1x8xf32>
    %49 = vector.shape_cast %48 : vector<1x8xf32> to vector<1x8x1xf32>
    %50 = vector.broadcast %49 : vector<1x8x1xf32> to vector<1x8x8xf32>
    %51 = arith.subf %47, %50 : vector<1x8x8xf32>
    %52 = math.exp %51 : vector<1x8x8xf32>
    %cst_53 = arith.constant dense<0.000000e+00> : vector<1x8xf32>
    %53 = vector.multi_reduction <add>, %52, %cst_53 [2] : vector<1x8x8xf32> to vector<1x8xf32>
    %54 = vector.shape_cast %53 : vector<1x8xf32> to vector<1x8x1xf32>
    %55 = vector.broadcast %54 : vector<1x8x1xf32> to vector<1x8x8xf32>
    %56 = arith.divf %52, %55 : vector<1x8x8xf32>
    "tpu.trace_start"() <{level = 10 : i32, message = "bqk,bkd->bqd"}> : () -> ()
    %cst_54 = arith.constant dense<0.000000e+00> : vector<1x8x8xf32>
    %57 = tpu.matmul %56, %44, %cst_54 {dimension_numbers = #tpu.dot_dimension_numbers<[2], [1], [1], [2], [0, 0, 0, 1, 1, 2], [0], [0]>} : vector<1x8x8xf32>, vector<1x8x8xf32>, vector<1x8x8xf32> -> vector<1x8x8xf32>
    "tpu.trace_stop"() : () -> ()
    %c0_55 = arith.constant 0 : index
    %c0_56 = arith.constant 0 : index
    %c8_57 = arith.constant 8 : index
    %58 = vector.load %arg11[%c0_55, %c0_56, %c8_57] : memref<1x8x32xf32, #tpu.memory_space<vmem>>, vector<1x8x8xf32>
    tpu.vector_store %arg11[%c0_55, %c0_56, %c8_57], %57 {strides = array<i32>} : memref<1x8x32xf32, #tpu.memory_space<vmem>>, vector<1x8x8xf32>,
    %c0_58 = arith.constant 0 : index
    %c0_59 = arith.constant 0 : index
    %c16 = arith.constant 16 : index
    %59 = vector.load %arg8[%c0_58, %c0_59, %c16] : memref<1x8x32xf32, #tpu.memory_space<vmem>>, vector<1x8x8xf32>
    %c0_60 = arith.constant 0 : index
    %c0_61 = arith.constant 0 : index
    %c16_62 = arith.constant 16 : index
    %60 = vector.load %arg9[%c0_60, %c0_61, %c16_62] : memref<1x8x32xf32, #tpu.memory_space<vmem>>, vector<1x8x8xf32>
    %c0_63 = arith.constant 0 : index
    %c0_64 = arith.constant 0 : index
    %c16_65 = arith.constant 16 : index
    %61 = vector.load %arg10[%c0_63, %c0_64, %c16_65] : memref<1x8x32xf32, #tpu.memory_space<vmem>>, vector<1x8x8xf32>
    "tpu.trace_start"() <{level = 10 : i32, message = "bqd,bkd->bqk"}> : () -> ()
    %cst_66 = arith.constant dense<0.000000e+00> : vector<1x8x8xf32>
    %62 = tpu.matmul %59, %60, %cst_66 {dimension_numbers = #tpu.dot_dimension_numbers<[2], [2], [1], [1], [0, 0, 0, 1, 1, 1], [0], [0]>} : vector<1x8x8xf32>, vector<1x8x8xf32>, vector<1x8x8xf32> -> vector<1x8x8xf32>
    %cst_67 = arith.constant 0xFF800000 : f32
    "tpu.trace_stop"() : () -> ()
    %63 = vector.broadcast %cst_67 : f32 to vector<1x8x8xf32>
    %64 = arith.select %24, %62, %63 : vector<1x8x8xi1>, vector<1x8x8xf32>
    %cst_68 = arith.constant dense<0xFF800000> : vector<1x8xf32>
    %65 = vector.multi_reduction <maximumf>, %64, %cst_68 [2] : vector<1x8x8xf32> to vector<1x8xf32>
    %66 = vector.shape_cast %65 : vector<1x8xf32> to vector<1x8x1xf32>
    %67 = vector.broadcast %66 : vector<1x8x1xf32> to vector<1x8x8xf32>
    %68 = arith.subf %64, %67 : vector<1x8x8xf32>
    %69 = math.exp %68 : vector<1x8x8xf32>
    %cst_69 = arith.constant dense<0.000000e+00> : vector<1x8xf32>
    %70 = vector.multi_reduction <add>, %69, %cst_69 [2] : vector<1x8x8xf32> to vector<1x8xf32>
    %71 = vector.shape_cast %70 : vector<1x8xf32> to vector<1x8x1xf32>
    %72 = vector.broadcast %71 : vector<1x8x1xf32> to vector<1x8x8xf32>
    %73 = arith.divf %69, %72 : vector<1x8x8xf32>
    "tpu.trace_start"() <{level = 10 : i32, message = "bqk,bkd->bqd"}> : () -> ()
    %cst_70 = arith.constant dense<0.000000e+00> : vector<1x8x8xf32>
    %74 = tpu.matmul %73, %61, %cst_70 {dimension_numbers = #tpu.dot_dimension_numbers<[2], [1], [1], [2], [0, 0, 0, 1, 1, 2], [0], [0]>} : vector<1x8x8xf32>, vector<1x8x8xf32>, vector<1x8x8xf32> -> vector<1x8x8xf32>
    "tpu.trace_stop"() : () -> ()
    %c0_71 = arith.constant 0 : index
    %c0_72 = arith.constant 0 : index
    %c16_73 = arith.constant 16 : index
    %75 = vector.load %arg11[%c0_71, %c0_72, %c16_73] : memref<1x8x32xf32, #tpu.memory_space<vmem>>, vector<1x8x8xf32>
    tpu.vector_store %arg11[%c0_71, %c0_72, %c16_73], %74 {strides = array<i32>} : memref<1x8x32xf32, #tpu.memory_space<vmem>>, vector<1x8x8xf32>,
    %c0_74 = arith.constant 0 : index
    %c0_75 = arith.constant 0 : index
    %c24 = arith.constant 24 : index
    %76 = vector.load %arg8[%c0_74, %c0_75, %c24] : memref<1x8x32xf32, #tpu.memory_space<vmem>>, vector<1x8x8xf32>
    %c0_76 = arith.constant 0 : index
    %c0_77 = arith.constant 0 : index
    %c24_78 = arith.constant 24 : index
    %77 = vector.load %arg9[%c0_76, %c0_77, %c24_78] : memref<1x8x32xf32, #tpu.memory_space<vmem>>, vector<1x8x8xf32>
    %c0_79 = arith.constant 0 : index
    %c0_80 = arith.constant 0 : index
    %c24_81 = arith.constant 24 : index
    %78 = vector.load %arg10[%c0_79, %c0_80, %c24_81] : memref<1x8x32xf32, #tpu.memory_space<vmem>>, vector<1x8x8xf32>
    "tpu.trace_start"() <{level = 10 : i32, message = "bqd,bkd->bqk"}> : () -> ()
    %cst_82 = arith.constant dense<0.000000e+00> : vector<1x8x8xf32>
    %79 = tpu.matmul %76, %77, %cst_82 {dimension_numbers = #tpu.dot_dimension_numbers<[2], [2], [1], [1], [0, 0, 0, 1, 1, 1], [0], [0]>} : vector<1x8x8xf32>, vector<1x8x8xf32>, vector<1x8x8xf32> -> vector<1x8x8xf32>
    %cst_83 = arith.constant 0xFF800000 : f32
    "tpu.trace_stop"() : () -> ()
    %80 = vector.broadcast %cst_83 : f32 to vector<1x8x8xf32>
    %81 = arith.select %24, %79, %80 : vector<1x8x8xi1>, vector<1x8x8xf32>
    %cst_84 = arith.constant dense<0xFF800000> : vector<1x8xf32>
    %82 = vector.multi_reduction <maximumf>, %81, %cst_84 [2] : vector<1x8x8xf32> to vector<1x8xf32>
    %83 = vector.shape_cast %82 : vector<1x8xf32> to vector<1x8x1xf32>
    %84 = vector.broadcast %83 : vector<1x8x1xf32> to vector<1x8x8xf32>
    %85 = arith.subf %81, %84 : vector<1x8x8xf32>
    %86 = math.exp %85 : vector<1x8x8xf32>
    %cst_85 = arith.constant dense<0.000000e+00> : vector<1x8xf32>
    %87 = vector.multi_reduction <add>, %86, %cst_85 [2] : vector<1x8x8xf32> to vector<1x8xf32>
    %88 = vector.shape_cast %87 : vector<1x8xf32> to vector<1x8x1xf32>
    %89 = vector.broadcast %88 : vector<1x8x1xf32> to vector<1x8x8xf32>
    %90 = arith.divf %86, %89 : vector<1x8x8xf32>
    "tpu.trace_start"() <{level = 10 : i32, message = "bqk,bkd->bqd"}> : () -> ()
    %cst_86 = arith.constant dense<0.000000e+00> : vector<1x8x8xf32>
    %91 = tpu.matmul %90, %78, %cst_86 {dimension_numbers = #tpu.dot_dimension_numbers<[2], [1], [1], [2], [0, 0, 0, 1, 1, 2], [0], [0]>} : vector<1x8x8xf32>, vector<1x8x8xf32>, vector<1x8x8xf32> -> vector<1x8x8xf32>
    "tpu.trace_stop"() : () -> ()
    %c0_87 = arith.constant 0 : index
    %c0_88 = arith.constant 0 : index
    %c24_89 = arith.constant 24 : index
    %92 = vector.load %arg11[%c0_87, %c0_88, %c24_89] : memref<1x8x32xf32, #tpu.memory_space<vmem>>, vector<1x8x8xf32>
    tpu.vector_store %arg11[%c0_87, %c0_88, %c24_89], %91 {strides = array<i32>} : memref<1x8x32xf32, #tpu.memory_space<vmem>>, vector<1x8x8xf32>,
    %c0_90 = arith.constant 0 : index
    %c0_91 = arith.constant 0 : index
    %c0_92 = arith.constant 0 : index
    %93 = vector.load %arg11[%c0_90, %c0_91, %c0_92] : memref<1x8x32xf32, #tpu.memory_space<vmem>>, vector<1x8x32xf32>
    %94 = vector.shape_cast %93 : vector<1x8x32xf32> to vector<8x32xf32>
    %cst_93 = arith.constant dense<0.000000e+00> : vector<8x32xf32>
    %95 = tpu.matmul %94, %19, %cst_93 {dimension_numbers = #tpu.dot_dimension_numbers<[1], [0], [0], [1], [0, 0, 1, 1], [], []>} : vector<8x32xf32>, vector<32x32xf32>, vector<8x32xf32> -> vector<8x32xf32>
    %96 = vector.broadcast %20 : vector<1x32xf32> to vector<8x32xf32>
    %97 = arith.addf %95, %96 : vector<8x32xf32>
    %98 = vector.shape_cast %97 : vector<8x32xf32> to vector<1x8x32xf32>
    %c0_94 = arith.constant 0 : index
    %c0_95 = arith.constant 0 : index
    %c0_96 = arith.constant 0 : index
    %99 = vector.load %arg7[%c0_94, %c0_95, %c0_96] : memref<1x8x32xf32, #tpu.memory_space<vmem>>, vector<1x8x32xf32>
    tpu.vector_store %arg7[%c0_94, %c0_95, %c0_96], %98 {strides = array<i32>} : memref<1x8x32xf32, #tpu.memory_space<vmem>>, vector<1x8x32xf32>,
    return
  }
  func.func @transform_0(%arg0: i32) -> (i32, i32, i32) {
    %c0_i32 = arith.constant 0 : i32
    %c0_i32_0 = arith.constant 0 : i32
    %c0_i32_1 = arith.constant 0 : i32
    return %arg0, %c0_i32, %c0_i32_0 : i32, i32, i32
  }
  func.func @transform_1(%arg0: i32) -> (i32, i32, i32) {
    %c0_i32 = arith.constant 0 : i32
    %c0_i32_0 = arith.constant 0 : i32
    %c0_i32_1 = arith.constant 0 : i32
    return %arg0, %c0_i32, %c0_i32_0 : i32, i32, i32
  }
  func.func @transform_2(%arg0: i32) -> (i32, i32, i32) {
    %c0_i32 = arith.constant 0 : i32
    %c0_i32_0 = arith.constant 0 : i32
    %c0_i32_1 = arith.constant 0 : i32
    return %arg0, %c0_i32, %c0_i32_0 : i32, i32, i32
  }
  func.func @transform_3(%arg0: i32) -> (i32, i32) {
    %c0_i32 = arith.constant 0 : i32
    %c0_i32_0 = arith.constant 0 : i32
    %c0_i32_1 = arith.constant 0 : i32
    return %c0_i32, %c0_i32_0 : i32, i32
  }
  func.func @transform_4(%arg0: i32) -> (i32, i32) {
    %c0_i32 = arith.constant 0 : i32
    %c0_i32_0 = arith.constant 0 : i32
    %c0_i32_1 = arith.constant 0 : i32
    return %c0_i32, %c0_i32_0 : i32, i32
  }
  func.func @transform_5(%arg0: i32) -> (i32, i32) {
    %c0_i32 = arith.constant 0 : i32
    %c0_i32_0 = arith.constant 0 : i32
    %c0_i32_1 = arith.constant 0 : i32
    return %c0_i32, %c0_i32_0 : i32, i32
  }
  func.func @transform_6(%arg0: i32) -> (i32, i32, i32) {
    %c0_i32 = arith.constant 0 : i32
    %c0_i32_0 = arith.constant 0 : i32
    %c0_i32_1 = arith.constant 0 : i32
    return %arg0, %c0_i32, %c0_i32_0 : i32, i32, i32
  }
}

</mosaic_0001>

<bundles_post_ra>
// kernel: _mha_impl.1
= control target key start
LH: loop header
LB: loop body
LE: loop exit
PB: predicated region body
PF: predicated region fallthrough
CT: control target
= control target key end

     0   :  { %11 = vsyncpa [#allocation7], 0  ;;  %s1990_s0 = inlined_call_operand.vmem [shape: f32[2,8,32], index: 0, kind: input, shape index: {}]   ;;  %s1991_s1 = inlined_call_operand.vmem [shape: f32[2,8,32], index: 1, kind: input, shape index: {}]   ;;  %s1992_s2 = inlined_call_operand.vmem [shape: f32[2,8,32], index: 2, kind: input, shape index: {}]   ;;  %s1993_s3 = inlined_call_operand.vmem [shape: f32[32,96], index: 3, kind: input, shape index: {}]   ;;  %s1994_s4 = inlined_call_operand.vmem [shape: f32[32,32], index: 4, kind: input, shape index: {}]   ;;  %s1995_s5 = inlined_call_operand.vmem [shape: f32[1,32], index: 5, kind: input, shape index: {}]   ;;  %s1996_s6 = inlined_call_operand.hbm [shape: f32[2,8,32], index: 6, kind: output, shape index: {}]  }
   0x1   :  { %13 = vsyncpa [#allocation7 + $0x1], 0  ;;  %s1749_s21 = smov 0   ;;  %s1751_s22 = smov 0  }
   0x2   :  { %s1753_s23 = smov 0   ;;  %s1755_s24 = smov 0  }
   0x3 LB: > { %s1770_s25 = sadd.s32 4294967295, %s1701_s24   ;;  %s1427_s26 = sadd.s32 4294967294, %s1701_s24   ;;  %s1701_s24 = sphi %s1755_s24, %s2002_s24   ;;  %s1697_s23 = sphi %s1753_s23, %s2001_s23   ;;  %s1693_s22 = sphi %s1751_s22, %s2000_s22   ;;  %s1689_s21 = sphi %s1749_s21, %s1999_s21  }
   0x4   : > { %s1774_s27 = sadd.s32 1, %s1701_s24   ;;  %s167_s28 = sadd.s32 1, %s1697_s23 }
   0x5   : > { %s164_s29 = ssub.s32 %s1701_s24, %s1774_s27  ;;  %p177_p0 = scmp.ne.s32.totalorder %s1697_s23, %s1693_s22 }
   0x6   : > { %p165_p1 = scmp.eq.s32.totalorder %s164_s29, 0  ;;  %p178_p2 = scmp.eq.s32.totalorder %s1770_s25, 1 }
   0x7   : > { %p183_p3 = scmp.ne.s32.totalorder %s1693_s22, %s1689_s21  ;;  %p184_p4 = scmp.eq.s32.totalorder %s1427_s26, 1 }
   0x8   : > { %s1785_s30 = scalar_select %p165_p1, %s1697_s23, %s167_s28  }
   0x9   : > { %p1787_p5 = por %p178_p2, %p177_p0  ;;  %p1791_p6 = por %p184_p4, %p183_p3 }
   0xa   : > { %p1430_p7 = scmp.ge.s32.totalorder %s1701_s24, 1  ;;  %p232_p8 = scmp.lt.s32.totalorder %s1701_s24, 3 }
   0xc   : > { %p233_p9 = pnand %p1430_p7, %p232_p8 }
   0xd   : > { %s1703_s13 = smov (!%p233_p9), 96   ;;  %p269_p10 = scmp.lt.s32.totalorder (!%p233_p9), %s1770_s25, 1 }
   0xe   : > { %236 = sbr.rel (%p233_p9) target bundleno = 1904 (0x770), region = 44  ;;  %s1706_s11 = smov (!%p233_p9), 64  }
   0xf   : > { %s1707_s12 = smov (!%p233_p9), 120   ;;  %s1708_s16 = smov (!%p233_p9), 112  }
  0x10   : > { %s1709_s17 = smov (!%p233_p9), 104   ;;  %s266_s14 = sand.u32 (!%p233_p9), 1, %s1693_s22  }
  0x11   : > { %s1331_s9 = scalar_lea.sflag (!%p233_p9), [#allocation7], %s266_s14 }
  0x13   : > { %v284_v0 = vld [vmem:[%s1993_s3 + $0x18] sm:$0xff]  ;;  %v282_v1 = vld [vmem:[%s1993_s3 + $0x8] sm:$0xff]  ;;  %v283_v2 = vld [vmem:[%s1993_s3 + $0x10] sm:$0xff]  ;;  %v1704_v4 = vmov 0.0   ;;  %vm1705_vm0 = vmmov 0   ;;  %s270_s18 = scalar_select %p269_p10, %s1770_s25, 1  ;;  %v544_v22 = vlaneseq }
  0x14   : > { %372 = vrot.lane.b32.xlu0 %v284_v0, %s1703_s13  ;;  %368 = vrot.lane.b32.xlu1 %v282_v1, %s1703_s13  ;;  %v281_v3 = vld [vmem:[%s1993_s3] sm:$0xff]  ;;  %vm286_vm1 = vcmask 261120   ;;  %vm552_vm2 = vcmask 64512   ;;  %vm891_vm4 = vcmask 130112   ;;  %vm1069_vm5 = vcmask 195712  }
  0x15   : > { %1503 = vmatprep.subr.mxu1 %v1704_v4  ;;  %1492 = vmatprep.subr.mxu0 %v1704_v4  ;;  %s1818_s19 = sshll.u32 %s270_s18, 3  ;;  %v1860_v23 = vshrl.u32 %v544_v22, 7  ;;  %v1862_v24 = vand.u32 127, %v544_v22  ;;  %vm1247_vm6 = vcmask 261312   ;;  %s1453_s18 = sshll.u32 %s1770_s25, 7 }
  0x16   : > { %1493 = vmatpush3.msra.mxu0 %v284_v0  ;;  %1511 = vmatprep.mubr.msk.f32.mxu1 %vm1705_vm0, %v1704_v4  ;;  %s272_s28 = scalar_lea.vmem %s1990_s0, %s1818_s19  ;;  %s276_s10 = scalar_lea.vmem %s1991_s1, %s1818_s19 }
  0x17   : > { %1494 = vmatprep.subr.mxu0 %v1704_v4  ;;  %1500 = vmatprep.mubr.msk.f32.mxu0 %vm1705_vm0, %v1704_v4  ;;  %v285_v5 = vld [vmem:[%s272_s28] sm:$0xff]  ;;  %s280_s15 = scalar_lea.vmem %s1992_s2, %s1818_s19  ;;  %vm548_vm3 = vcmp.le.s32.totalorder %v1862_v24, %v1860_v23  ;;  %v542_v24 = vld [vmem:[%s1994_s4 + $0x18] sm:$0xff]  ;;  %s1954_s29 = scalar_lea.hbm %s1996_s6, %s1453_s18 }
  0x18   : > { %370 = vrot.lane.b32.xlu0 %v283_v2, %s1703_s13  ;;  %366 = vrot.lane.b32.xlu1 %v281_v3, %s1703_s13  ;;  %v361_v10 = vld [vmem:[%s276_s10] sm:$0xff]  ;;  %s1712_s13 = smov 24   ;;  %s1713_s25 = smov [#allocation6]  }
  0x19   : > { %1495 = vmatpush3.msra.mxu0 %v283_v2  ;;  %v452_v20 = vld [vmem:[%s280_s15] sm:$0xff]  ;;  %s1431_s15 = sshll.u32 %s266_s14, 3 }
  0x1a   : > { %1496 = vmatprep.subr.mxu0 %v1704_v4  ;;  %s268_s19 = scalar_lea.vmem [#allocation6], %s1431_s15 }
  0x1b   : > { %1497 = vmatpush3.msra.mxu0 %v282_v1  ;;  %s1344_s20 = sshll.u32 %s268_s19, 4  ;;  %s1345_s20 = int_to_ptr.vmem [resolvable:$true] %s1344_s20 }
  0x1c   : > { %1498 = vmatprep.subr.mxu0 %v1704_v4  ;;  %457 = vrot.lane.b32.xlu1 %v283_v2, %s1706_s11  ;;  %s1641_s10 = scalar_lea.vmem %s1345_s20, 128 }
  0x1d   : > { %1499 = vmatpush3.msra.mxu0 %v281_v3  ;;  %459 = vrot.lane.b32.xlu0 %v284_v0, %s1706_s11  ;;  %p1642_p11 = scmp.ne.s32.totalorder %s1345_s20, %s1641_s10 }
  0x1e   : > { %1501 = vmatmul.mubr.msk.f32.vlgmr.msra.gmra.mxu0 %vm286_vm1, %v285_v5  ;;  %1514 = vmatprep.subr.mxu0 %v1704_v4 }
  0x1f   : > { %1522 = vmatprep.mubr.msk.f32.mxu0 %vm1705_vm0, %v1704_v4  ;;  %p1643_p12 = pnand %p1642_p11, %p1787_p5 }
  0x20   : > { %453 = vrot.lane.b32.xlu1 %v281_v3, %s1706_s11 }
  0x21   : > { %455 = vrot.lane.b32.xlu0 %v282_v1, %s1706_s11  ;;  %s1710_s11 = smov 8   ;;  %p1644_p13 = pneg %p1643_p12 }
  0x86   : > { %v373_v6 = vpop.permute.xlu0 %372  ;;  %v369_v7 = vpop.permute.xlu1 %368 }
  0x87   : > { %1504 = vmatpush3.msra.mxu1 %v373_v6 }
  0x88   : > { %1505 = vmatprep.subr.mxu1 %v1704_v4 }
  0x8a   : > { %v371_v8 = vpop.permute.xlu0 %370  ;;  %v367_v9 = vpop.permute.xlu1 %366 }
  0x8b   : > { %1506 = vmatpush3.msra.mxu1 %v371_v8 }
  0x8c   : > { %1507 = vmatprep.subr.mxu1 %v1704_v4 }
  0x8d   : > { %1508 = vmatpush3.msra.mxu1 %v369_v7 }
  0x8e   : > { %1509 = vmatprep.subr.mxu1 %v1704_v4  ;;  %v458_v17 = vpop.permute.xlu1 %457 }
  0x8f   : > { %1510 = vmatpush3.msra.mxu1 %v367_v9  ;;  %v460_v18 = vpop.permute.xlu0 %459 }
  0x90   : > { %1512 = vmatmul.mubr.msk.f32.vlgmr.msra.gmra.mxu1 %vm286_vm1, %v361_v10  ;;  %1525 = vmatprep.subr.mxu1 %v1704_v4 }
  0x91   : > { %1527 = vmatprep.mubr.msk.f32.mxu1 %vm1705_vm0, %v1704_v4  ;;  %1515 = vmatpush3.msra.mxu0 %v460_v18 }
  0x92   : > { %1516 = vmatprep.subr.mxu0 %v1704_v4  ;;  %v454_v21 = vpop.permute.xlu1 %453 }
  0x93   : > { %1517 = vmatpush3.msra.mxu0 %v458_v17  ;;  %v456_v19 = vpop.permute.xlu0 %455 }
  0x94   : > { %1518 = vmatprep.subr.mxu0 %v1704_v4 }
  0x95   : > { %1519 = vmatpush3.msra.mxu0 %v456_v19 }
  0x96   : > { %1520 = vmatprep.subr.mxu0 %v1704_v4 }
  0x97   : > { %1521 = vmatpush3.msra.mxu0 %v454_v21 }
  0x98   : > { %1523 = vmatmul.mubr.msk.f32.vlgmr.msra.gmra.mxu0 %vm286_vm1, %v452_v20  ;;  %1545 = vmatprep.subr.mxu0 %v1704_v4 }
  0x99   : > { %1547 = vmatprep.mubr.msk.f32.mxu0 %vm1705_vm0, %v1704_v4 }
  0xde   : > { %v356_v11 = vpop.f32.mrf.mxu0 }
  0xdf   : > { %360 = vst.msk [vmem:[#allocation2] sm:$0xff] %vm286_vm1, %v356_v11 }
  0xe0   : > { %v1502_v12 = vpop.f32.mrf.mxu0 }
  0xe6   : > { %v549_v13 = vld [vmem:[#allocation2] sm:$0xff] }
  0xe7   : > { %719 = vrot.lane.b32.xlu1 %v549_v13, %s1707_s12 }
 0x150   : > { %v447_v14 = vpop.f32.mrf.mxu1 }
 0x151   : > { %451 = vst.msk [vmem:[#allocation3] sm:$0xff] %vm286_vm1, %v447_v14 }
 0x152   : > { %v1513_v15 = vpop.f32.mrf.mxu1 }
 0x158   : > { %v550_v16 = vld [vmem:[#allocation3] sm:$0xff]  ;;  %v534_v36 = vpop.f32.mrf.mxu0 }
 0x159   : > { %1526 = vmatpush3.xpose.msk.msra.mxu1 %vm552_vm2, %v550_v16  ;;  %538 = vst.msk [vmem:[#allocation4] sm:$0xff] %vm286_vm1, %v534_v36  ;;  %v720_v39 = vpop.permute.xlu1 %719 }
 0x15a   : > { %1530 = vmatprep.subr.mxu1 %v1704_v4  ;;  %v1524_v37 = vpop.f32.mrf.mxu0 }
 0x15b   : > { %v1450_v37 = vld [vmem:[%s1995_s5] ss:$0 sm:$0xff] }
 0x15c   : > { %1528 = vmatmul.mubr.msk.f32.vlgmr.msra.gmra.mxu1 %vm552_vm2, %v549_v13 }
 0x15d   : > { %1532 = vmatprep.mubr.msk.f32.mxu1 %vm1705_vm0, %v1704_v4 }
 0x160   : > { %v1878_v38 = vld [vmem:[#allocation4] sm:$0xff] }
 0x161   : > { %1531 = vmatpush3.msra.mxu1 %v1878_v38 }
 0x162   : > { %1535 = vmatprep.subr.mxu1 %v1704_v4 }
 0x21c   : > { %v625_v25 = vpop.f32.mrf.mxu1 }
 0x21d   : > { %v629_v26 = vsel %vm548_vm3, %v625_v25, -inf  ;;  %v541_v25 = vld [vmem:[%s1994_s4 + $0x10] sm:$0xff] }
 0x21e   : > { %v1529_v27 = vpop.f32.mrf.mxu1  ;;  %v630_v28 = vsel %vm552_vm2, %v629_v26, -inf }
 0x21f   : > { %631 = vmax.xlane.f32.xlu0 %v630_v28  ;;  %v539_v28 = vld [vmem:[%s1994_s4] sm:$0xff] }
 0x235   : > { %722 = vrot.lane.b32.xlu0 %v550_v16, %s1707_s12 }
 0x239   : > { %900 = vrot.lane.b32.xlu0 %v550_v16, %s1708_s16 }
 0x23d   : > { %1078 = vrot.lane.b32.xlu0 %v550_v16, %s1709_s17 }
 0x2a8   : > { %v632_v29 = vpop.xlane.xlu0 %631 }
 0x2a9   : > { %v633_v30 = vsub.f32 %v629_v26, %v632_v29  ;;  %v540_v26 = vld [vmem:[%s1994_s4 + $0x8] sm:$0xff] }
 0x2ab   : > { %v634_v31 = vmul.f32 1.442695, %v633_v30 }
 0x2ac   : > { %v723_v32 = vpop.permute.xlu0 %722 }
 0x2ad   : > { %1625 = vpow2.f32 %v634_v31 }
 0x2b0   : > { %v901_v33 = vpop.permute.xlu0 %900 }
 0x2b1   : > { %1546 = vmatpush3.xpose.msk.msra.mxu0 %vm552_vm2, %v901_v33 }
 0x2b2   : > { %1555 = vmatprep.subr.mxu0 %v1704_v4 }
 0x2b4   : > { %v1079_v42 = vpop.permute.xlu0 %1078 }
 0x2ba   : > { %v1626_v34 = vpop.eup %1625 }
 0x2bb   : > { %v636_v35 = vsel %vm552_vm2, %v1626_v34, 0.0 }
 0x2bc   : > { %637 = vadd.xlane.f32.xlu1 %v636_v35 }
 0x2cd   : > { %897 = vrot.lane.b32.xlu1 %v549_v13, %s1708_s16 }
 0x2d1   : > { %1075 = vrot.lane.b32.xlu1 %v549_v13, %s1709_s17 }
 0x345   : > { %v638_v40 = vpop.xlane.xlu1 %637 }
 0x346   : > { %1627 = vrcp.f32 %v638_v40 }
 0x349   : > { %v898_v41 = vpop.permute.xlu1 %897 }
 0x34a   : > { %1548 = vmatmul.mubr.msk.f32.vlgmr.msra.gmra.mxu0 %vm552_vm2, %v898_v41 }
 0x34b   : > { %1556 = vmatpush3.xpose.msk.msra.mxu0 %vm552_vm2, %v1079_v42  ;;  %1557 = vmatprep.mubr.msk.f32.mxu0 %vm1705_vm0, %v1704_v4 }
 0x34c   : > { %1565 = vmatprep.subr.mxu0 %v1704_v4 }
 0x34d   : > { %v1076_v43 = vpop.permute.xlu1 %1075 }
 0x34e   : > { %1558 = vmatmul.mubr.msk.f32.vlgmr.msra.gmra.mxu0 %vm552_vm2, %v1076_v43 }
 0x34f   : > { %1573 = vmatprep.mubr.msk.f32.mxu0 %vm1705_vm0, %v1704_v4  ;;  %1566 = vmatpush3.msra.mxu0 %v542_v24 }
 0x350   : > { %1567 = vmatprep.subr.mxu0 %v1704_v4 }
 0x351   : > { %1568 = vmatpush3.msra.mxu0 %v541_v25 }
 0x352   : > { %1569 = vmatprep.subr.mxu0 %v1704_v4 }
 0x353   : > { %v1628_v44 = vpop.eup %1627  ;;  %1570 = vmatpush3.msra.mxu0 %v540_v26 }
 0x354   : > { %v640_v45 = vmul.f32 %v1628_v44, %v1626_v34  ;;  %1571 = vmatprep.subr.mxu0 %v1704_v4 }
 0x355   : > { %1572 = vmatpush3.msra.mxu0 %v539_v28 }
 0x356   : > { %1533 = vmatmul.mubr.msk.f32.vlgmr.msra.gmra.mxu1 %vm552_vm2, %v640_v45 }
 0x357   : > { %1536 = vmatpush3.xpose.msk.msra.mxu1 %vm552_vm2, %v723_v32  ;;  %1537 = vmatprep.mubr.msk.f32.mxu1 %vm1705_vm0, %v1704_v4 }
 0x358   : > { %1540 = vmatprep.subr.mxu1 %v1704_v4 }
 0x35a   : > { %1538 = vmatmul.mubr.msk.f32.vlgmr.msra.gmra.mxu1 %vm552_vm2, %v720_v39 }
 0x35b   : > { %1542 = vmatprep.mubr.msk.f32.mxu1 %vm1705_vm0, %v1704_v4 }
 0x40a   : > { %v972_v46 = vpop.f32.mrf.mxu0 }
 0x40b   : > { %v976_v47 = vsel %vm548_vm3, %v972_v46, -inf }
 0x40c   : > { %v1549_v48 = vpop.f32.mrf.mxu0  ;;  %v977_v49 = vsel %vm552_vm2, %v976_v47, -inf }
 0x40d   : > { %978 = vmax.xlane.f32.xlu1 %v977_v49 }
 0x40e   : > { %v1150_v50 = vpop.f32.mrf.mxu0 }
 0x40f   : > { %v1154_v58 = vsel %vm548_vm3, %v1150_v50, -inf }
 0x410   : > { %v1559_v51 = vpop.f32.mrf.mxu0  ;;  %v1155_v59 = vsel %vm552_vm2, %v1154_v58, -inf }
 0x416   : > { %v710_v52 = vpop.f32.mrf.mxu1 }
 0x417   : > { %714 = vst.msk [vmem:[#allocation5] sm:$0xff] %vm552_vm2, %v710_v52 }
 0x418   : > { %v1534_v53 = vpop.f32.mrf.mxu1 }
 0x41a   : > { %v794_v54 = vpop.f32.mrf.mxu1 }
 0x41b   : > { %v798_v55 = vsel %vm548_vm3, %v794_v54, -inf }
 0x41c   : > { %v1539_v56 = vpop.f32.mrf.mxu1  ;;  %v799_v57 = vsel %vm552_vm2, %v798_v55, -inf }
 0x41d   : > { %800 = vmax.xlane.f32.xlu0 %v799_v57 }
 0x421   : > { %1156 = vmax.xlane.f32.xlu0 %v1155_v59 }
 0x496   : > { %v979_v60 = vpop.xlane.xlu1 %978 }
 0x497   : > { %v980_v61 = vsub.f32 %v976_v47, %v979_v60 }
 0x499   : > { %v981_v62 = vmul.f32 1.442695, %v980_v61 }
 0x49b   : > { %1629 = vpow2.f32 %v981_v62 }
 0x4a6   : > { %v801_v63 = vpop.xlane.xlu0 %800 }
 0x4a7   : > { %v802_v1 = vsub.f32 %v798_v55, %v801_v63 }
 0x4a8   : > { %v1630_v0 = vpop.eup %1629 }
 0x4a9   : > { %v983_v2 = vsel %vm552_vm2, %v1630_v0, 0.0  ;;  %v803_v6 = vmul.f32 1.442695, %v802_v1 }
 0x4aa   : > { %984 = vadd.xlane.f32.xlu1 %v983_v2  ;;  %v1157_v3 = vpop.xlane.xlu0 %1156 }
 0x4ab   : > { %v1158_v5 = vsub.f32 %v1154_v58, %v1157_v3 }
 0x4ad   : > { %v1159_v7 = vmul.f32 1.442695, %v1158_v5 }
 0x4af   : > { %1631 = vpow2.f32 %v1159_v7 }
 0x4b0   : > { %1633 = vpow2.f32 %v803_v6 }
 0x4bb   : > { %811 = vrot.lane.b32.xlu1 %v1878_v38, %s1707_s12  ;;  %s1711_s12 = smov 16  }
 0x4bc   : > { %v1632_v8 = vpop.eup %1631 }
 0x4bd   : > { %v1161_v9 = vsel %vm552_vm2, %v1632_v8, 0.0  ;;  %v1634_v10 = vpop.eup %1633 }
 0x4be   : > { %1162 = vadd.xlane.f32.xlu0 %v1161_v9  ;;  %v805_v11 = vsel %vm552_vm2, %v1634_v10, 0.0 }
 0x4bf   : > { %1167 = vrot.lane.b32.xlu1 %v1878_v38, %s1709_s17 }
 0x4c2   : > { %806 = vadd.xlane.f32.xlu0 %v805_v11 }
 0x4d8   : > { %989 = vrot.lane.b32.xlu0 %v1878_v38, %s1708_s16 }
 0x533   : > { %v985_v12 = vpop.xlane.xlu1 %984 }
 0x537   : > { %v812_v13 = vpop.permute.xlu1 %811 }
 0x538   : > { %1541 = vmatpush3.msra.mxu1 %v812_v13 }
 0x539   : > { %1550 = vmatprep.subr.mxu1 %v1704_v4 }
 0x53b   : > { %v1168_v22 = vpop.permute.xlu1 %1167 }
 0x547   : > { %v1163_v14 = vpop.xlane.xlu0 %1162 }
 0x54b   : > { %v807_v15 = vpop.xlane.xlu0 %806 }
 0x54c   : > { %1635 = vrcp.f32 %v807_v15 }
 0x54d   : > { %1637 = vrcp.f32 %v985_v12 }
 0x54e   : > { %1639 = vrcp.f32 %v1163_v14 }
 0x54f   : > { %v990_v19 = vpop.permute.xlu0 %989 }
 0x559   : > { %v1636_v16 = vpop.eup %1635 }
 0x55a   : > { %v809_v17 = vmul.f32 %v1636_v16, %v1634_v10  ;;  %v1638_v18 = vpop.eup %1637 }
 0x55b   : > { %v987_v20 = vmul.f32 %v1638_v18, %v1630_v0  ;;  %v1640_v21 = vpop.eup %1639 }
 0x55c   : > { %1543 = vmatmul.mubr.msk.f32.vlgmr.msra.gmra.mxu1 %vm552_vm2, %v809_v17  ;;  %v1165_v23 = vmul.f32 %v1640_v21, %v1632_v8 }
 0x55d   : > { %1551 = vmatpush3.msra.mxu1 %v990_v19  ;;  %1552 = vmatprep.mubr.msk.f32.mxu1 %vm1705_vm0, %v1704_v4 }
 0x55e   : > { %1560 = vmatprep.subr.mxu1 %v1704_v4 }
 0x560   : > { %1553 = vmatmul.mubr.msk.f32.vlgmr.msra.gmra.mxu1 %vm552_vm2, %v987_v20 }
 0x561   : > { %1561 = vmatpush3.msra.mxu1 %v1168_v22  ;;  %1562 = vmatprep.mubr.msk.f32.mxu1 %vm1705_vm0, %v1704_v4 }
 0x564   : > { %1563 = vmatmul.mubr.msk.f32.vlgmr.msra.gmra.mxu1 %vm552_vm2, %v1165_v23 }
 0x61c   : > { %v883_v27 = vpop.f32.mrf.mxu1 }
 0x61d   : > { %888 = vrot.lane.b32.xlu1 %v883_v27, %s1710_s11  ;;  %s1645_s11 = sshll.u32 %s1713_s25, 4  ;;  %s1646_s11 = int_to_ptr.vmem [resolvable:$false] %s1645_s11 }
 0x61e   : > { %v1544_v29 = vpop.f32.mrf.mxu1  ;;  %p1648_p0 = scmp.lt.s32.totalorder %s1345_s20, %s1646_s11 }
 0x620   : > { %v1061_v30 = vpop.f32.mrf.mxu1 }
 0x621   : > { %1066 = vrot.lane.b32.xlu0 %v1061_v30, %s1711_s12  ;;  %s1647_s12 = scalar_lea.vmem %s1646_s11, 256 }
 0x622   : > { %v1554_v31 = vpop.f32.mrf.mxu1  ;;  %p1649_p1 = scmp.lt.s32.totalorder %s1647_s12, %s1641_s10 }
 0x624   : > { %v1239_v32 = vpop.f32.mrf.mxu1  ;;  %p1650_p2 = por %p1649_p1, %p1648_p0 }
 0x625   : > { %1244 = vrot.lane.b32.xlu1 %v1239_v32, %s1712_s13 }
 0x626   : > { %v1564_v33 = vpop.f32.mrf.mxu1  ;;  %p1651_p3 = pnand %p1650_p2, %p1644_p13 }
 0x68f   : > { %v889_v34 = vpop.permute.xlu1 %888 }
 0x690   : > { %892 = vst.msk [vmem:[#allocation5] sm:$0xff] %vm891_vm4, %v889_v34 }
 0x693   : > { %v1067_v35 = vpop.permute.xlu0 %1066 }
 0x694   : > { %1070 = vst.msk [vmem:[#allocation5] sm:$0xff] %vm1069_vm5, %v1067_v35 }
 0x697   : > { %v1245_v36 = vpop.permute.xlu1 %1244 }
 0x698   : > { %1248 = vst.msk [vmem:[#allocation5] sm:$0xff] %vm1247_vm6, %v1245_v36 }
 0x69f   : > { %v1249_v4 = vld [vmem:[#allocation5] sm:$0xff] }
 0x6a0   : > { %1574 = vmatmul.mubr.msk.f32.vlgmr.msra.gmra.mxu0 %vm286_vm1, %v1249_v4 }
 0x760   : > { %v1325_v38 = vpop.f32.mrf.mxu0 }
 0x761   : > { %v1326_v39 = vadd.f32 %v1450_v37, %v1325_v38 }
 0x762   : > { %v1575_v40 = vpop.f32.mrf.mxu0 }
 0x763   : > { %1329 = vst.msk [vmem:[%s268_s19] sm:$0xff] %vm286_vm1, %v1326_v39 }
 0x764   : > { %1654 = shalt.err (!%p1651_p3)
}
 0x765   : > { %s1655_s13 = scalar_lea.hbm %s1954_s29, 128  ;;  %s1659_s16 = scalar_lea.hbm %s1996_s6, 256 }
 0x766   : > { %p1656_p4 = scmp.ne.s32.totalorder %s1954_s29, %s1655_s13  ;;  %p1660_p9 = scmp.lt.s32.totalorder %s1954_s29, %s1996_s6 }
 0x767   : > { %p1661_p10 = scmp.lt.s32.totalorder %s1659_s16, %s1655_s13 }
 0x768   : > { %p1657_p7 = pnand %p1656_p4, %p1787_p5 }
 0x769   : > { %p1662_p11 = por %p1661_p10, %p1660_p9 }
 0x76a   : > { %p1658_p8 = pneg %p1657_p7 }
 0x76c   : > { %p1663_p12 = pnand %p1662_p11, %p1658_p8 }
 0x76e   : > { %1666 = shalt.err (!%p1663_p12)
}
 0x76f   : > { %1576 = dma.vmem_to_hbm [thread:$0]  (%p1787_p5), %s1345_s20, 128, %s1954_s29, %s1331_s9  }
 0x770 PF: > { %p1582_p13 = scmp.ge.s32.totalorder %s1701_s24, 2  ;;  %s1356_s19 = sand.u32 1, %s1689_s21  }
 0x771   : > { %s1357_s26 = scalar_lea.sflag [#allocation7], %s1356_s19 }
 0x772   : > { %p1579_p0 = pnand %p1582_p13, %p1791_p6 }
 0x774   : > { %p1580_p1 = pneg %p1579_p0 }
 0x776   : > { %1684 = dma.done.wait (%p1580_p1), %s1357_s26, 128  }
 0x777   : > { %1686 = vsyncadd (%p1580_p1), %s1357_s26, 4294967168  ;;  %p16_p2 = scmp.ge.s32.totalorder %s1774_s27, 4   ;;  %s1999_s21 = smov %s1693_s22 }
 0x778   : > { %s2000_s22 = smov %s1697_s23  ;;  %s2001_s23 = smov %s1785_s30 }
 0x779   : > { %s2002_s24 = smov %s1774_s27  ;;  %18 = sbr.rel (!%p16_p2) target bundleno = 3 (0x3), region = 85 }
 0x77e   :  { %1362 = vsyncpa [#allocation7], 1 }
 0x77f   :  { %1364 = vsyncpa [#allocation7 + $0x1], 1 }

</bundles_post_ra>
